<compile_context>
chip_gen: v6e
topology: v6e:2x2x1
jax: 0.10.0
libtpu: 0.0.40
codegen_flags: <defaults>
</compile_context>

<pallas_src>
import functools

import jax
import jax.numpy as jnp
from jax import lax
from jax.experimental import pallas as pl
from jax.experimental.pallas import tpu as pltpu


def _round_up(x, m):
    return ((x + m - 1) // m) * m


def _vmem_budget_bytes():
    """VMEM budget with headroom, derived from the actual chip capacity."""
    cap = 64 * 1024 * 1024                      # safe lower bound (v7x physical)
    try:
        info_cap = pltpu.get_tpu_info().vmem_capacity_bytes
        if info_cap:
            cap = int(info_cap)
    except Exception:
        pass
    # 75% of physical, capped at 100 MiB (v5e/v6e have 128 MiB, v7x has 64 MiB).
    return min((cap * 3) // 4, 100 * 1024 * 1024)


def _select_tile_n(N, C, itemsize, vmem_budget, target_step_bytes):
    """Lane-dense (multiple of 128) N tile sized by streamed bytes per step."""
    n128 = _round_up(N, 128)
    # Pass 2 streams ~2*C*tn*itemsize per grid step (x in + out out).
    tn_target = max(128, (target_step_bytes // (2 * C * itemsize)) // 128 * 128)
    # VMEM cap: double-buffered x tile + double-buffered out tile + f32 temps.
    per_col = C * (4 * itemsize + 8)
    avail = max(per_col * 128, vmem_budget - 4 * C * C * 4 - (2 << 20))
    tn_cap = max(128, (avail // per_col) // 128 * 128)
    tn_max = max(128, min(tn_target, tn_cap))
    if n128 <= tn_max:
        return n128
    # Balanced tiles: waste is < 128 columns instead of up to ~tn_max.
    n_tiles = pl.cdiv(n128, tn_max)
    return _round_up(pl.cdiv(n128, n_tiles), 128)


# ---------------------------------------------------------------------------
# Fused single-pass kernel: whole per-batch (C, N) slab resident in VMEM.
# ---------------------------------------------------------------------------
def _fused_kernel(gamma_ref, x_ref, o_ref):
    x = x_ref[0]                                           # (C, N), native dtype
    xf = x.astype(jnp.float32)
    # Gram matrix: contract the lane dim of both operands (no explicit transpose).
    energy = lax.dot_general(
        x, x, dimension_numbers=(((1,), (1,)), ((), ())),
        preferred_element_type=jnp.float32)                # (C, C) f32
    e_max = jnp.max(energy, axis=-1, keepdims=True)
    p = jnp.exp(energy - e_max)
    denom = jnp.sum(p, axis=-1, keepdims=True)
    inv = pl.reciprocal(denom, approx=True)                # EUP slot
    inv = inv * (2.0 - denom * inv)                        # one Newton step -> f32 accurate
    attn = p * inv                                         # (C, C) f32
    out = jnp.dot(attn, xf, preferred_element_type=jnp.float32)  # (C, N) f32
    o_ref[0] = (gamma_ref[0, 0] * out + xf).astype(o_ref.dtype)


# ---------------------------------------------------------------------------
# Streaming pass 1: accumulate energy over N tiles, fuse softmax at the last tile.
# ---------------------------------------------------------------------------
def _attn_kernel(x_ref, attn_ref, *, n_total):
    n = pl.program_id(1)
    tn = x_ref.shape[2]

    @pl.when(n == 0)
    def _():
        attn_ref[...] = jnp.zeros_like(attn_ref)

    x = x_ref[0]                                           # (C, tn), native dtype
    if n_total % tn != 0:
        # Ragged last tile: zero the out-of-range columns (exact for the Gram matrix).
        col = lax.broadcasted_iota(jnp.int32, x.shape, 1) + n * tn
        x = jnp.where(col < n_total, x, jnp.zeros_like(x))

    attn_ref[0] += lax.dot_general(
        x, x, dimension_numbers=(((1,), (1,)), ((), ())),
        preferred_element_type=jnp.float32)

    # Fused softmax epilogue: overwrite the resident energy block with attention.
    @pl.when(n == pl.num_programs(1) - 1)
    def _():
        energy = attn_ref[0]
        e_max = jnp.max(energy, axis=-1, keepdims=True)
        p = jnp.exp(energy - e_max)
        denom = jnp.sum(p, axis=-1, keepdims=True)
        inv = pl.reciprocal(denom, approx=True)
        inv = inv * (2.0 - denom * inv)
        attn_ref[0] = p * inv


# ---------------------------------------------------------------------------
# Streaming pass 2: out_tile = gamma * (attention @ x_tile) + x_tile.
# Every grid step is independent (attention precomputed), so both axes are parallel.
# Out-of-bounds columns of the ragged last tile are discarded on store.
# ---------------------------------------------------------------------------
def _apply_kernel(gamma_ref, attn_ref, x_ref, o_ref):
    x = x_ref[0].astype(jnp.float32)                       # (C, tn)
    attn = attn_ref[0]                                     # (C, C) f32
    out = jnp.dot(attn, x, preferred_element_type=jnp.float32)
    o_ref[0] = (gamma_ref[0, 0] * out + x).astype(o_ref.dtype)


def ca_block(x, gamma, *, target_step_bytes=6 * 1024 * 1024, allow_fused=True):
    """x: (B, C, H, W, L); gamma: scalar parameter (init 1.0)."""
    B, C, H, W, L = x.shape
    N = H * W * L
    x_flat = x.reshape(B, C, N)
    itemsize = x_flat.dtype.itemsize
    gamma_arr = jnp.asarray(gamma, jnp.float32).reshape(1, 1)
    vmem_budget = _vmem_budget_bytes()

    # ---- Fused single-pass path: read X from HBM once per batch element. ----
    fused_bytes = 4 * C * N * itemsize + 3 * C * N * 4 + 8 * C * C * 4
    if allow_fused and fused_bytes <= vmem_budget:
        out_flat = pl.pallas_call(
            _fused_kernel,
            out_shape=jax.ShapeDtypeStruct((B, C, N), x.dtype),
            grid=(B,),
            in_specs=[
                pl.BlockSpec(memory_space=pltpu.MemorySpace.SMEM),     # gamma
                pl.BlockSpec((1, C, N), lambda b: (b, 0, 0)),          # x slab
            ],
            out_specs=pl.BlockSpec((1, C, N), lambda b: (b, 0, 0)),
            compiler_params=pltpu.CompilerParams(
                dimension_semantics=("parallel",),
                vmem_limit_bytes=vmem_budget),
            cost_estimate=pl.CostEstimate(
                flops=4 * B * C * C * N + 3 * B * C * N,
                transcendentals=B * C * C,
                bytes_accessed=2 * B * C * N * itemsize),
        )(gamma_arr, x_flat)
        return out_flat.reshape(B, C, H, W, L)

    # ---- Two-pass streaming path for large N. ----
    tn = _select_tile_n(N, C, itemsize, vmem_budget, target_step_bytes)
    n_tiles = pl.cdiv(N, tn)

    # Pass 1: attention = softmax(X @ X^T), accumulated over streamed N tiles.
    attn = pl.pallas_call(
        functools.partial(_attn_kernel, n_total=N),
        out_shape=jax.ShapeDtypeStruct((B, C, C), jnp.float32),
        grid=(B, n_tiles),
        in_specs=[pl.BlockSpec((1, C, tn), lambda b, n: (b, 0, n))],
        out_specs=pl.BlockSpec((1, C, C), lambda b, n: (b, 0, 0)),
        compiler_params=pltpu.CompilerParams(
            dimension_semantics=("parallel", "arbitrary"),
            vmem_limit_bytes=vmem_budget),
        cost_estimate=pl.CostEstimate(
            flops=2 * B * C * C * N,
            transcendentals=B * C * C,
            bytes_accessed=B * C * N * itemsize + B * C * C * 4),
    )(x_flat)

    # Pass 2: out = gamma * (attention @ X) + X, streamed over N tiles.
    out_flat = pl.pallas_call(
        _apply_kernel,
        out_shape=jax.ShapeDtypeStruct((B, C, N), x.dtype),
        grid=(B, n_tiles),
        in_specs=[
            pl.BlockSpec(memory_space=pltpu.MemorySpace.SMEM),   # gamma scalar
            pl.BlockSpec((1, C, C), lambda b, n: (b, 0, 0)),     # attention, resident
            pl.BlockSpec((1, C, tn), lambda b, n: (b, 0, n)),    # x tile
        ],
        out_specs=pl.BlockSpec((1, C, tn), lambda b, n: (b, 0, n)),
        compiler_params=pltpu.CompilerParams(
            dimension_semantics=("parallel", "parallel"),        # N shards across TCs on v7x
            vmem_limit_bytes=vmem_budget),
        cost_estimate=pl.CostEstimate(
            flops=2 * B * C * C * N + 3 * B * C * N,
            transcendentals=0,
            bytes_accessed=2 * B * C * N * itemsize + B * C * C * 4),
    )(gamma_arr, attn, x_flat)

    return out_flat.reshape(B, C, H, W, L)


def ca_block_ref(x, gamma):
    """Pure-JAX reference matching the PyTorch module."""
    B, C, H, W, L = x.shape
    X = x.reshape(B, C, -1).astype(jnp.float32)
    energy = jnp.einsum("bcn,bdn->bcd", X, X)
    attn = jax.nn.softmax(energy, axis=-1)
    out = jnp.einsum("bcd,bdn->bcn", attn, X)
    out = out.reshape(B, C, H, W, L)
    return (gamma * out + x.astype(jnp.float32)).astype(x.dtype)


if __name__ == "__main__":
    key = jax.random.PRNGKey(0)

    # Test 1: fused single-pass path (per-batch slab fits VMEM).
    B, C, H, W, L = 2, 4, 8, 8, 8             # N = 512
    x = jax.random.normal(key, (B, C, H, W, L), dtype=jnp.float32)
    gamma = 1.0                               # nn.Parameter(torch.ones(1)) init
    out = jax.block_until_ready(ca_block(x, gamma))
    ref = ca_block_ref(x, gamma)
    assert out.shape == (B, C, H, W, L)
    assert jnp.allclose(out, ref, atol=1e-3, rtol=1e-3), "fused path mismatch vs reference"

    # Test 2: streaming two-pass path with a ragged N (N = 315, tn = 128 -> 3 tiles,
    # last tile masked in-kernel; no jnp.pad / slice in the wrapper).
    B2, C2, H2, W2, L2 = 2, 8, 5, 7, 9        # N = 315
    x2 = jax.random.normal(jax.random.PRNGKey(1), (B2, C2, H2, W2, L2), dtype=jnp.float32)
    gamma2 = 0.75
    out2 = jax.block_until_ready(
        ca_block(x2, gamma2, allow_fused=False, target_step_bytes=4096))
    ref2 = ca_block_ref(x2, gamma2)
    assert out2.shape == (B2, C2, H2, W2, L2)
    assert jnp.allclose(out2, ref2, atol=1e-3, rtol=1e-3), "streaming path mismatch vs reference"

    print("KERNEL_OK")
</pallas_src>

<mosaic_0001>
module attributes {stable_mosaic.version = 11 : i64} {
  func.func @_fused_kernel(%arg0: i32, %arg1: memref<1x1xf32, #tpu.memory_space<smem>>, %arg2: memref<1x4x512xf32, #tpu.memory_space<vmem>>, %arg3: memref<1x4x512xf32, #tpu.memory_space<vmem>>) attributes {dimension_semantics = [#tpu.dimension_semantics<parallel>], iteration_bounds = array<i64: 2>, scalar_prefetch = 0 : i64, scratch_operands = 0 : i64, tpu.core_type = #tpu.core_type<tc>, window_params = [{transform_indices = @transform_0, window_bounds = array<i64: 1, 1>}, {transform_indices = @transform_1, window_bounds = array<i64: 1, 4, 512>}, {transform_indices = @transform_2, window_bounds = array<i64: 1, 4, 512>}]} {
    %c0 = arith.constant 0 : index
    %c0_0 = arith.constant 0 : index
    %c0_1 = arith.constant 0 : index
    %0 = vector.load %arg2[%c0, %c0_0, %c0_1] : memref<1x4x512xf32, #tpu.memory_space<vmem>>, vector<1x4x512xf32>
    %1 = vector.shape_cast %0 : vector<1x4x512xf32> to vector<4x512xf32>
    %cst = arith.constant dense<0.000000e+00> : vector<4x4xf32>
    %2 = tpu.matmul %1, %1, %cst {dimension_numbers = #tpu.dot_dimension_numbers<[1], [1], [0], [0], [0, 0, 1, 0], [], []>} : vector<4x512xf32>, vector<4x512xf32>, vector<4x4xf32> -> vector<4x4xf32>
    %cst_2 = arith.constant dense<0xFF800000> : vector<4xf32>
    %3 = vector.multi_reduction <maximumf>, %2, %cst_2 [1] : vector<4x4xf32> to vector<4xf32>
    %4 = vector.shape_cast %3 : vector<4xf32> to vector<4x1xf32>
    %5 = vector.broadcast %4 : vector<4x1xf32> to vector<4x4xf32>
    %6 = arith.subf %2, %5 : vector<4x4xf32>
    %7 = math.exp %6 : vector<4x4xf32>
    %cst_3 = arith.constant dense<0.000000e+00> : vector<4xf32>
    %8 = vector.multi_reduction <add>, %7, %cst_3 [1] : vector<4x4xf32> to vector<4xf32>
    %9 = vector.shape_cast %8 : vector<4xf32> to vector<4x1xf32>
    %10 = tpu.reciprocal %9 {approx = true} : vector<4x1xf32> -> vector<4x1xf32>
    %11 = arith.mulf %9, %10 : vector<4x1xf32>
    %cst_4 = arith.constant 2.000000e+00 : f32
    %12 = vector.broadcast %cst_4 : f32 to vector<4x1xf32>
    %13 = arith.subf %12, %11 : vector<4x1xf32>
    %14 = arith.mulf %10, %13 : vector<4x1xf32>
    %15 = vector.broadcast %14 : vector<4x1xf32> to vector<4x4xf32>
    %16 = arith.mulf %7, %15 : vector<4x4xf32>
    %cst_5 = arith.constant dense<0.000000e+00> : vector<4x512xf32>
    %17 = tpu.matmul %16, %1, %cst_5 {dimension_numbers = #tpu.dot_dimension_numbers<[1], [0], [0], [1], [0, 0, 1, 1], [], []>} : vector<4x4xf32>, vector<4x512xf32>, vector<4x512xf32> -> vector<4x512xf32>
    %c0_6 = arith.constant 0 : index
    %c0_7 = arith.constant 0 : index
    %18 = memref.load %arg1[%c0_6, %c0_7] : memref<1x1xf32, #tpu.memory_space<smem>>
    %19 = vector.broadcast %18 : f32 to vector<4x512xf32>
    %20 = arith.mulf %19, %17 : vector<4x512xf32>
    %21 = arith.addf %20, %1 : vector<4x512xf32>
    %c0_8 = arith.constant 0 : index
    %c0_9 = arith.constant 0 : index
    %c0_10 = arith.constant 0 : index
    %22 = vector.load %arg3[%c0_8, %c0_9, %c0_10] : memref<1x4x512xf32, #tpu.memory_space<vmem>>, vector<1x4x512xf32>
    %23 = vector.shape_cast %22 : vector<1x4x512xf32> to vector<4x512xf32>
    %24 = vector.shape_cast %21 : vector<4x512xf32> to vector<1x4x512xf32>
    tpu.vector_store %arg3[%c0_8, %c0_9, %c0_10], %24 {strides = array<i32>} : memref<1x4x512xf32, #tpu.memory_space<vmem>>, vector<1x4x512xf32>,
    return
  }
  func.func @transform_0(%arg0: i32) -> (i32, i32) {
    %c0_i32 = arith.constant 0 : i32
    %c0_i32_0 = arith.constant 0 : i32
    %c0_i32_1 = arith.constant 0 : i32
    return %c0_i32, %c0_i32_0 : i32, i32
  }
  func.func @transform_1(%arg0: i32) -> (i32, i32, i32) {
    %c0_i32 = arith.constant 0 : i32
    %c0_i32_0 = arith.constant 0 : i32
    %c0_i32_1 = arith.constant 0 : i32
    return %arg0, %c0_i32, %c0_i32_0 : i32, i32, i32
  }
  func.func @transform_2(%arg0: i32) -> (i32, i32, i32) {
    %c0_i32 = arith.constant 0 : i32
    %c0_i32_0 = arith.constant 0 : i32
    %c0_i32_1 = arith.constant 0 : i32
    return %arg0, %c0_i32, %c0_i32_0 : i32, i32, i32
  }
}

</mosaic_0001>

<bundles_post_ra>
// kernel: tpu_custom_call.1
= control target key start
LH: loop header
LB: loop body
LE: loop exit
PB: predicated region body
PF: predicated region fallthrough
CT: control target
= control target key end

     0   :  { %s925_s0 = inlined_call_operand.<no memory space> [shape: f32[1,1], index: 0, kind: input, shape index: {}]   ;;  %s926_s1 = inlined_call_operand.hbm [shape: f32[2,4,512], index: 1, kind: input, shape index: {}]   ;;  %s927_s2 = inlined_call_operand.hbm [shape: f32[2,4,512], index: 2, kind: output, shape index: {}]  }
   0x1   :  { %7 = sst [smem:[#allocation2]] %s925_s0 }
   0x2   :  { %8 = vsyncpa [#allocation4], 0 }
   0x3   :  { %10 = vsyncpa [#allocation4 + $0x1], 0 }
   0x4   :  { %11 = vsyncpa [#allocation5], 0 }
   0x5   :  { %13 = vsyncpa [#allocation5 + $0x1], 0  ;;  %s774_s11 = smov 0   ;;  %s776_s12 = smov 0  }
   0x6   :  { %s778_s13 = smov 0   ;;  %s780_s14 = smov 0  }
   0x7 LB: > { %s795_s0 = sadd.s32 4294967295, %s751_s14   ;;  %s584_s15 = sadd.s32 4294967294, %s751_s14   ;;  %s751_s14 = sphi %s780_s14, %s944_s14   ;;  %s747_s13 = sphi %s778_s13, %s943_s13   ;;  %s743_s12 = sphi %s776_s12, %s942_s12   ;;  %s739_s11 = sphi %s774_s11, %s941_s11  }
   0x8   : > { %s799_s16 = sadd.s32 1, %s751_s14   ;;  %s47_s17 = sadd.s32 1, %s747_s13 }
   0x9   : > { %s44_s18 = ssub.s32 %s751_s14, %s799_s16  ;;  %p54_p0 = scmp.ne.s32.totalorder %s747_s13, %s743_s12 }
   0xa   : > { %p45_p1 = scmp.eq.s32.totalorder %s44_s18, 0  ;;  %p55_p2 = scmp.eq.s32.totalorder %s751_s14, 0 }
   0xb   : > { %p60_p3 = scmp.ne.s32.totalorder %s743_s12, %s739_s11  ;;  %p61_p4 = scmp.eq.s32.totalorder %s795_s0, 0 }
   0xc   : > { %s811_s19 = scalar_select %p45_p1, %s747_s13, %s47_s17  }
   0xd   : > { %p813_p5 = por %p55_p2, %p54_p0  ;;  %p817_p6 = por %p61_p4, %p60_p3 }
   0xe   : > { %p84_p7 = scmp.eq.s32.totalorder %s795_s0, 1  ;;  %p90_p8 = scmp.eq.s32.totalorder %s584_s15, 1 }
   0xf   : > { %s931_s21 = scalar_select %p817_p6, 1, 0 }
  0x10   : > { %p618_p10 = scmp.lt.s32.totalorder %s751_s14, 2  ;;  %p824_p11 = por %p84_p7, %p54_p0 }
  0x11   : > { %p828_p12 = por %p90_p8, %p60_p3  ;;  %s113_s24 = sand.u32 1, %s747_s13  }
  0x12   : > { %s932_s22 = scalar_select %p824_p11, 1, 0 }
  0x13   : > { %s933_s23 = scalar_select %p828_p12, 1, 0 }
  0x14   : > { %s604_s25 = sshll.u32 %s751_s14, 8  ;;  %s587_s26 = sshll.u32 %s113_s24, 4 }
  0x15   : > { %s837_s29 = scalar_lea.hbm %s926_s1, %s604_s25  ;;  %s117_s30 = scalar_lea.vmem [#allocation3], %s587_s26 }
  0x16   : > { %s125_s3 = sshll.u32 %s117_s30, 4  ;;  %p841_p13 = pnand %p618_p10, %p813_p5  ;;  %s845_s3 = int_to_ptr.vmem [resolvable:$true] %s125_s3 }
  0x17   : > { %s114_s5 = scalar_lea.sflag [#allocation4], %s113_s24  ;;  %s659_s6 = scalar_lea.hbm %s837_s29, 256 }
  0x18   : > { %p660_p2 = scmp.ne.s32.totalorder %s837_s29, %s659_s6  ;;  %p661_p3 = pneg %p841_p13 }
  0x19   : > { %s664_s9 = scalar_lea.hbm %s926_s1, 512  ;;  %p665_p5 = scmp.lt.s32.totalorder %s837_s29, %s926_s1 }
  0x1a   : > { %p662_p4 = pnand %p661_p3, %p660_p2  ;;  %p666_p8 = scmp.lt.s32.totalorder %s664_s9, %s659_s6 }
  0x1c   : > { %p663_p7 = pneg %p662_p4  ;;  %p667_p10 = por %p666_p8, %p665_p5 }
  0x1e   : > { %p668_p9 = pnand %p667_p10, %p663_p7 }
  0x20   : > { %671 = shalt.err (!%p668_p9)
}
  0x21   : > { %s672_s17 = scalar_lea.vmem %s845_s3, 256  ;;  %s753_s18 = smov [#allocation3]  }
  0x22   : > { %p673_p0 = scmp.ne.s32.totalorder %s845_s3, %s672_s17  ;;  %s677_s20 = sshll.u32 %s753_s18, 4  ;;  %s678_s20 = int_to_ptr.vmem [resolvable:$false] %s677_s20 }
  0x23   : > { %s679_s24 = scalar_lea.vmem %s678_s20, 512  ;;  %p680_p4 = scmp.lt.s32.totalorder %s845_s3, %s678_s20 }
  0x24   : > { %p675_p1 = pnand %p673_p0, %p661_p3  ;;  %p681_p12 = scmp.lt.s32.totalorder %s679_s24, %s672_s17 }
  0x26   : > { %p676_p2 = pneg %p675_p1  ;;  %p682_p11 = por %p681_p12, %p680_p4 }
  0x28   : > { %p683_p6 = pnand %p682_p11, %p676_p2 }
  0x2a   : > { %686 = shalt.err (!%p683_p6)
}
  0x2b   : > { %613 = dma.hbm_to_vmem [thread:$0]  (!%p841_p13), %s837_s29, 256, %s845_s3, %s114_s5  }
  0x2c   : > { %p935_p9 = scmp.lt.s32.totalorder %s751_s14, 3  ;;  %p936_p7 = scmp.ge.s32.totalorder %s751_s14, 1 }
  0x2e   : > { %p131_p0 = pnand %p936_p7, %p935_p9 }
  0x2f   : > { %s872_s25 = sand.u32 (!%p131_p0), 1, %s743_s12   ;;  %p937_p6 = scmp.ne.s32.totalorder (!%p131_p0), %s931_s21, 0 }
  0x30   : > { %134 = sbr.rel (%p131_p0) target bundleno = 788 (0x314), region = 28  ;;  %s591_s26 = sshll.u32 (!%p131_p0), %s872_s25, 4 }
  0x31   : > { %s137_s27 = scalar_lea.sflag (!%p131_p0), [#allocation4], %s872_s25  ;;  %s140_s28 = scalar_lea.vmem (!%p131_p0), [#allocation3], %s591_s26 }
  0x35   : > { %730 = dma.done.wait (%p937_p6), %s137_s27, 256  }
  0x36   : > { %732 = vsyncadd (%p937_p6), %s137_s27, 4294967040  ;;  %v161_v0 = vld [vmem:[%s140_s28] sm:$0xff]  ;;  %v162_v1 = vld [vmem:[%s140_s28 + $0x8] sm:$0xff]  ;;  %vm309_vm0 = vcmask 27648   ;;  %vm328_vm1 = vcmask 1043456   ;;  %v754_v15 = vmov 0.0  }
  0x37   : > { %v165_v2 = vcombine.high %v161_v0, %v161_v0  ;;  %v166_v3 = vcombine.high %v162_v1, %v162_v1  ;;  %vm324_vm2 = vcmask 31744   ;;  %s479_s21 = sld [smem:[#allocation2]]  ;;  %s605_s29 = sshll.u32 %s795_s0, 8 }
  0x38   : > { %s160_s30 = scalar_lea.vmem [#allocation6], %s591_s26  ;;  %s888_s6 = scalar_lea.hbm %s927_s2, %s605_s29 }
  0x39   : > { %199 = vmatprep.subr.mxu0 %v165_v2  ;;  %269 = vmatprep.subr.mxu1 %v166_v3  ;;  %s514_s3 = sshll.u32 %s160_s30, 4  ;;  %s500_s7 = scalar_lea.sflag [#allocation5], %s872_s25  ;;  %s515_s3 = int_to_ptr.vmem [resolvable:$true] %s514_s3 }
  0x3a   : > { %200 = vmatpush1.xpose.msra.mxu0 %v161_v0  ;;  %270 = vmatpush1.xpose.msra.mxu1 %v162_v1  ;;  %s687_s0 = scalar_lea.vmem %s515_s3, 256  ;;  %p938_p12 = scmp.ne.s32.totalorder %s932_s22, 0 }
  0x3b   : > { %233 = vmatprep.mubr.f32.mxu0 %v165_v2  ;;  %303 = vmatprep.mubr.f32.mxu1 %v166_v3  ;;  %p688_p11 = scmp.ne.s32.totalorder %s515_s3, %s687_s0  ;;  %s755_s8 = smov [#allocation6]  }
  0x3c   : > { %593 = vmatprep.subr.msk.mxu0 %vm328_vm1, %v165_v2  ;;  %596 = vmatprep.subr.msk.mxu1 %vm328_vm1, %v166_v3  ;;  %s691_s9 = sshll.u32 %s755_s8, 4  ;;  %s692_s9 = int_to_ptr.vmem [resolvable:$false] %s691_s9 }
  0x3d   : > { %234 = vmatmul.mubr.f32.vlgmr.msra.gmra.mxu0 %v161_v0  ;;  %304 = vmatmul.mubr.f32.vlgmr.msra.gmra.mxu1 %v162_v1  ;;  %v480_v22 = vstv %s479_s21  ;;  %p689_p13 = pnand %p688_p11, %p938_p12  ;;  %s693_s10 = scalar_lea.vmem %s692_s9, 512 }
  0x3e   : > { %594 = vmatpush1.msk.msra.mxu0 %vm328_vm1, %v161_v0  ;;  %597 = vmatpush1.msk.msra.mxu1 %vm328_vm1, %v162_v1  ;;  %p694_p3 = scmp.lt.s32.totalorder %s515_s3, %s692_s9  ;;  %p695_p5 = scmp.lt.s32.totalorder %s693_s10, %s687_s0 }
  0x3f   : > { %401 = vmatprep.mubr.f32.mxu0 %v754_v15  ;;  %472 = vmatprep.mubr.f32.mxu1 %v754_v15  ;;  %p690_p1 = pneg %p689_p13 }
  0x40   : > { %p696_p8 = por %p695_p5, %p694_p3 }
  0x42   : > { %p697_p10 = pnand %p696_p8, %p690_p1 }
  0xfd   : > { %v235_v4 = vpop.f32.mrf.mxu0  ;;  %v305_v5 = vpop.f32.mrf.mxu1 }
  0xfe   : > { %v306_v6 = vadd.f32 %v305_v5, %v235_v4 }
  0xff   : > { %v237_v7 = vpop.f32.mrf.mxu0  ;;  %v307_v8 = vpop.f32.mrf.mxu1 }
 0x100   : > { %v310_v9 = vsel %vm309_vm0, %v306_v6, -inf }
 0x101   : > { %311 = vmax.xlane.f32.xlu0 %v310_v9 }
 0x18a   : > { %v312_v10 = vpop.xlane.xlu0 %311 }
 0x18b   : > { %v313_v11 = vsub.f32 %v306_v6, %v312_v10 }
 0x18d   : > { %v314_v12 = vmul.f32 1.442695, %v313_v11 }
 0x18f   : > { %655 = vpow2.f32 %v314_v12 }
 0x19c   : > { %v656_v13 = vpop.eup %655 }
 0x19d   : > { %v316_v14 = vsel %vm309_vm0, %v656_v13, 0.0 }
 0x19e   : > { %317 = vadd.xlane.f32.xlu0 %v316_v14 }
 0x227   : > { %v318_v16 = vpop.xlane.xlu0 %317 }
 0x228   : > { %657 = vrcp.f32 %v318_v16 }
 0x235   : > { %v658_v17 = vpop.eup %657 }
 0x236   : > { %v320_v18 = vmul.f32 %v658_v17, %v318_v16 }
 0x238   : > { %v321_v19 = vsub.f32 2.0, %v320_v18 }
 0x23a   : > { %v322_v20 = vmul.f32 %v658_v17, %v321_v19 }
 0x23c   : > { %v323_v21 = vmul.f32 %v656_v13, %v322_v20 }
 0x23e   : > { %595 = vmatmul.mubr.msk.f32.vlgmr.msra.gmra.mxu0 %vm324_vm2, %v323_v21  ;;  %598 = vmatmul.mubr.msk.f32.vlgmr.msra.gmra.mxu1 %vm324_vm2, %v323_v21 }
 0x2fe   : > { %v403_v23 = vpop.f32.mrf.mxu0  ;;  %v474_v24 = vpop.f32.mrf.mxu1 }
 0x2ff   : > { %v481_v25 = vmul.f32 %v480_v22, %v403_v23  ;;  %v483_v26 = vmul.f32 %v480_v22, %v474_v24 }
 0x300   : > { %v405_v27 = vpop.f32.mrf.mxu0  ;;  %v476_v28 = vpop.f32.mrf.mxu1 }
 0x301   : > { %v482_v29 = vmul.f32 %v480_v22, %v405_v27  ;;  %v484_v30 = vmul.f32 %v480_v22, %v476_v28  ;;  %v485_v31 = vadd.f32 %v481_v25, %v161_v0  ;;  %v487_v32 = vadd.f32 %v483_v26, %v162_v1 }
 0x303   : > { %v486_v33 = vadd.f32 %v482_v29, %v165_v2  ;;  %v488_v34 = vadd.f32 %v484_v30, %v166_v3 }
 0x305   : > { %v493_v35 = vcombine.low %v485_v31, %v486_v33  ;;  %v494_v36 = vcombine.low %v487_v32, %v488_v34 }
 0x307   : > { %497 = vst [vmem:[%s160_s30] sm:$0xff] %v493_v35  ;;  %498 = vst [vmem:[%s160_s30 + $0x8] sm:$0xff] %v494_v36 }
 0x308   : > { %700 = shalt.err (!%p697_p10)
}
 0x309   : > { %s701_s15 = scalar_lea.hbm %s888_s6, 256  ;;  %s705_s20 = scalar_lea.hbm %s927_s2, 512 }
 0x30a   : > { %p702_p2 = scmp.ne.s32.totalorder %s888_s6, %s701_s15  ;;  %p706_p7 = scmp.lt.s32.totalorder %s888_s6, %s927_s2 }
 0x30b   : > { %p707_p0 = scmp.lt.s32.totalorder %s705_s20, %s701_s15 }
 0x30c   : > { %p703_p4 = pnand %p702_p2, %p938_p12 }
 0x30d   : > { %p708_p6 = por %p707_p0, %p706_p7 }
 0x30e   : > { %p704_p9 = pneg %p703_p4 }
 0x310   : > { %p709_p11 = pnand %p708_p6, %p704_p9 }
 0x312   : > { %712 = shalt.err (!%p709_p11)
}
 0x313   : > { %608 = dma.vmem_to_hbm [thread:$0]  (%p938_p12), %s515_s3, 256, %s888_s6, %s500_s7  }
 0x314 PF: > { %s526_s26 = sand.u32 1, %s739_s11   ;;  %p939_p13 = scmp.ne.s32.totalorder %s933_s23, 0 }
 0x315   : > { %p940_p1 = scmp.ge.s32.totalorder %s751_s14, 2  ;;  %s527_s27 = scalar_lea.sflag [#allocation5], %s526_s26 }
 0x317   : > { %p615_p3 = pnand %p940_p1, %p939_p13 }
 0x319   : > { %p616_p5 = pneg %p615_p3 }
 0x31b   : > { %734 = dma.done.wait (%p616_p5), %s527_s27, 256  }
 0x31c   : > { %736 = vsyncadd (%p616_p5), %s527_s27, 4294967040  ;;  %p16_p8 = scmp.ge.s32.totalorder %s799_s16, 4   ;;  %s941_s11 = smov %s743_s12 }
 0x31d   : > { %s942_s12 = smov %s747_s13  ;;  %s943_s13 = smov %s811_s19 }
 0x31e   : > { %s944_s14 = smov %s799_s16  ;;  %18 = sbr.rel (!%p16_p8) target bundleno = 7 (0x7), region = 73 }
 0x323   :  { %532 = vsyncpa [#allocation4], 1 }
 0x324   :  { %534 = vsyncpa [#allocation4 + $0x1], 1 }
 0x325   :  { %535 = vsyncpa [#allocation5], 1 }
 0x326   :  { %537 = vsyncpa [#allocation5 + $0x1], 1 }

</bundles_post_ra>
